<compile_context>
chip_gen: v5e
topology: v5e:2x2
jax: 0.10.0
libtpu: 0.0.40
codegen_flags: <defaults>
</compile_context>

<pallas_src>
import functools

import jax
import jax.numpy as jnp
from jax.experimental import pallas as pl
from jax.experimental.pallas import tpu as pltpu

LANE = 128
_TARGET_M_CHUNK = 2048         # up to 2048 * 128 * 4B = 1 MiB membrane scratch
_TARGET_BLOCK_BYTES = 8 << 20  # ~8 MiB per pipelined DMA slab
_MAX_TT = 8                    # keep the static time unroll small; spend bytes on m_chunk


def _round_up(n, m):
    return -(-n // m) * m


def _vmem_capacity_bytes():
    # Generation-aware VMEM cap (v5e/v6e: 128 MiB, v7x: 64 MiB per TensorCore).
    try:
        cap = getattr(pltpu.get_tpu_info(), "vmem_capacity_bytes", None)
        if cap:
            return int(cap)
    except Exception:
        pass
    return 64 << 20  # conservative fallback (v7x per-TC)


def _lif_kernel(x_ref, out_ref, u_ref, *, u_th, beta, tt, t_rem):
    # x_ref / out_ref: (tt, m_chunk, 128) slab for the current (spatial chunk, time block).
    # u_ref: (m_chunk, 128) f32 membrane potential; persists across the time grid axis
    # (axis 1, "arbitrary", innermost) and resets at the first time block of each spatial
    # chunk.  Do NOT reorder the grid axes or mark the time axis "parallel".
    ti = pl.program_id(1)

    @pl.when(ti == 0)
    def _():
        u_ref[...] = jnp.zeros_like(u_ref)

    last_t = pl.num_programs(1) - 1

    def step(i):
        u = beta * u_ref[...] + x_ref[i].astype(jnp.float32)
        fire = u > u_th
        u_ref[...] = jnp.where(fire, u - u_th, u)   # reset-by-subtraction (== u - spk * u_th)
        out_ref[i] = fire.astype(out_ref.dtype)

    # Static unroll over the packed time steps (tt <= 8).
    # NOTE (v5e micro-opt, deliberately not done): carrying u in registers across the tt
    # steps would halve vst pressure, but only matters if a bundle dump shows the store
    # slot exposed above the HBM floor.
    for i in range(tt):
        if t_rem == 0 or i < t_rem:
            step(i)
        else:
            # cdiv time chunking: guard the padded trailing steps of the final time block so
            # out-of-bounds inputs never feed the membrane state / (dropped) tail outputs.
            pl.when(ti < last_t)(functools.partial(step, i))


def leaky_plain_forward(x, batch_size, u_th, beta, out_dtype=None, alias_input=False):
    """x: (num_steps * batch_size, C, H, W), time-major blocks of batch_size.

    out_dtype: spike dtype. Defaults to x.dtype (module semantics); int8 / bfloat16 are
        recommended when downstream accepts them (this kernel is HBM-bound, so a narrow
        0/1 output is ~1.6x less traffic end-to-end).
    alias_input: reuse the input HBM buffer for the output (only when out_dtype == x.dtype
        and N is lane-aligned).  Use only with donated / jit-scoped inputs.
    """
    TB, C, H, W = x.shape
    assert TB % batch_size == 0, "leading dim must be num_steps * batch_size"
    T = TB // batch_size
    N = batch_size * C * H * W
    out_dtype = jnp.dtype(x.dtype) if out_dtype is None else jnp.dtype(out_dtype)
    in_itemsize = jnp.dtype(x.dtype).itemsize
    out_itemsize = out_dtype.itemsize

    # ---- lane tiling: M x 128; no host pad when N is already lane-aligned (common case) ----
    M = -(-N // LANE)
    lane_pad = M * LANE - N
    x_flat = x.reshape(T, N)
    if lane_pad:
        # TODO(synk): unaligned N still pays one host-side pad + un-pad pass; an in-kernel
        # lane-tail mask (scalar-prefetch N + broadcasted_iota) would remove it.
        x_flat = jnp.pad(x_flat, ((0, 0), (0, lane_pad)))
    x_tiled = x_flat.reshape(T, M, LANE)

    # ---- spatial chunking (cdiv; ragged last chunk is masked by the pipeline) ----
    # Sublane granule: 8 f32 rows, scaled up so packed in/out dtypes stay tile-aligned.
    sub_mult = 8 * max(4 // in_itemsize, 4 // out_itemsize, 1)
    if M <= sub_mult:
        m_chunk = M                        # full-dim block (exempt from the /8 rule)
    else:
        # Always >= 2 spatial chunks so the "parallel" axis feeds both v7x TensorCores;
        # prefer >= 4 chunks when each chunk still keeps >= 512 sublanes (bandwidth-safe).
        half = _round_up(-(-M // 2), sub_mult)
        quarter = _round_up(-(-M // 4), sub_mult)
        m_chunk = min(_TARGET_M_CHUNK, quarter if quarter >= 512 else half)
    n_m = -(-M // m_chunk)

    # ---- time packing: tt steps per grid step toward an ~8 MiB slab, tt <= 8 ----
    bytes_per_step = m_chunk * LANE * in_itemsize
    tt = max(1, min(T, _MAX_TT, _TARGET_BLOCK_BYTES // bytes_per_step))
    n_t = -(-T // tt)
    t_rem = T % tt

    kernel = functools.partial(
        _lif_kernel, u_th=float(u_th), beta=float(beta), tt=tt, t_rem=t_rem
    )

    # Double-buffered input + output slabs, membrane scratch, plus compiler headroom.
    in_blk = tt * m_chunk * LANE * in_itemsize
    out_blk = tt * m_chunk * LANE * out_itemsize
    scratch = m_chunk * LANE * 4
    need = 2 * (in_blk + out_blk) + scratch + (2 << 20)
    vmem_limit = int(min(max(need, 16 << 20), int(0.8 * _vmem_capacity_bytes())))

    aliases = {}
    if alias_input and out_dtype == jnp.dtype(x.dtype) and lane_pad == 0:
        aliases = {0: 0}

    # NOTE: on 128 MiB-VMEM parts (v5e/v6e) pipeline_mode=pl.Buffered(3) on the in_spec or
    # ~16 MiB slabs are a further few-percent option; not enabled here to keep one code
    # path that also stays comfortably inside v7x's 64 MiB.
    out_tiled = pl.pallas_call(
        kernel,
        out_shape=jax.ShapeDtypeStruct((T, M, LANE), out_dtype),
        grid_spec=pltpu.PrefetchScalarGridSpec(
            num_scalar_prefetch=0,
            grid=(n_m, n_t),
            in_specs=[pl.BlockSpec((tt, m_chunk, LANE), lambda mi, ti: (ti, mi, 0))],
            out_specs=pl.BlockSpec((tt, m_chunk, LANE), lambda mi, ti: (ti, mi, 0)),
            scratch_shapes=[pltpu.VMEM((m_chunk, LANE), jnp.float32)],
        ),
        compiler_params=pltpu.CompilerParams(
            # Spatial chunks are independent -> megacore-parallel on v7x; time must stay
            # the last, sequential ("arbitrary") axis so the membrane scratch carries.
            dimension_semantics=("parallel", "arbitrary"),
            vmem_limit_bytes=vmem_limit,
        ),
        cost_estimate=pl.CostEstimate(
            flops=4 * T * M * LANE,
            transcendentals=0,
            bytes_accessed=T * M * LANE * (in_itemsize + out_itemsize),
        ),
        input_output_aliases=aliases,
    )(x_tiled)

    out = out_tiled.reshape(T, M * LANE)
    if lane_pad:
        out = out[:, :N]
    return out.reshape(TB, C, H, W)


def leaky_plain_reference(x, batch_size, u_th, beta):
    """Pure-JAX reference (lax.scan over time) for validation."""
    TB, C, H, W = x.shape
    T = TB // batch_size
    xt = x.reshape(T, batch_size, C, H, W)

    def step(u, x_t):
        u = beta * u + x_t
        spk = (u > u_th).astype(x.dtype)
        u = u - spk * u_th
        return u, spk

    u0 = jnp.zeros((batch_size, C, H, W), jnp.float32)
    _, spikes = jax.lax.scan(step, u0, xt)
    return spikes.reshape(TB, C, H, W)


if __name__ == "__main__":
    u_th, beta = 1.0, 0.5
    key = jax.random.PRNGKey(0)

    # Case 1: module-consistent small shape (batch=2, C=4, 16x16, num_steps=8).
    # N = 2048 is lane-aligned -> no host pad; 2 spatial chunks (both v7x cores busy).
    batch_size, num_steps, C, H, W = 2, 8, 4, 16, 16
    x = jax.random.uniform(
        key, (num_steps * batch_size, C, H, W), dtype=jnp.float32, minval=0.0, maxval=2.0
    )
    ref = leaky_plain_reference(x, batch_size, u_th, beta)

    out = jax.block_until_ready(leaky_plain_forward(x, batch_size, u_th, beta))
    assert out.shape == x.shape and out.dtype == x.dtype
    assert jnp.array_equal(out, ref), "f32 Pallas LIF mismatch vs reference"

    # Narrow spike dtype (recommended for this HBM-bound op): int8 output.
    out_i8 = jax.block_until_ready(
        leaky_plain_forward(x, batch_size, u_th, beta, out_dtype=jnp.int8)
    )
    assert jnp.array_equal(out_i8, ref.astype(jnp.int8)), "int8 Pallas LIF mismatch"

    # Case 2: ragged everything — N % 128 != 0 (lane-pad fallback), M % m_chunk != 0 and
    # T % tt != 0 (cdiv chunking + guarded trailing time steps).
    b2, t2, C2, H2, W2 = 2, 9, 4, 17, 17
    x2 = jax.random.uniform(
        jax.random.PRNGKey(0), (t2 * b2, C2, H2, W2), dtype=jnp.float32, minval=0.0, maxval=2.0
    )
    ref2 = leaky_plain_reference(x2, b2, u_th, beta)
    out2 = jax.block_until_ready(leaky_plain_forward(x2, b2, u_th, beta))
    assert jnp.array_equal(out2, ref2), "ragged-shape Pallas LIF mismatch vs reference"

    print("KERNEL_OK")
</pallas_src>

<mosaic_0001>
module attributes {stable_mosaic.version = 11 : i64} {
  func.func @_lif_kernel(%arg0: i32, %arg1: i32, %arg2: memref<8x8x128xf32, #tpu.memory_space<vmem>>, %arg3: memref<8x8x128xf32, #tpu.memory_space<vmem>>, %arg4: memref<8x128xf32, #tpu.memory_space<vmem>>) attributes {dimension_semantics = [#tpu.dimension_semantics<parallel>, #tpu.dimension_semantics<arbitrary>], iteration_bounds = array<i64: 2, 1>, scalar_prefetch = 0 : i64, scratch_operands = 1 : i64, tpu.core_type = #tpu.core_type<tc>, window_params = [{transform_indices = @transform_0, window_bounds = array<i64: 8, 8, 128>}, {transform_indices = @transform_1, window_bounds = array<i64: 8, 8, 128>}]} {
    %c0_i32 = arith.constant 0 : i32
    %0 = arith.cmpi eq, %arg1, %c0_i32 : i32
    %1 = arith.extui %0 : i1 to i32
    %c0_i32_0 = arith.constant 0 : i32
    %2 = arith.cmpi ne, %1, %c0_i32_0 : i32
    scf.if %2 {
      %cst_96 = arith.constant 0.000000e+00 : f32
      %139 = vector.broadcast %cst_96 : f32 to vector<8x128xf32>
      %c0_97 = arith.constant 0 : index
      %c0_98 = arith.constant 0 : index
      %140 = vector.load %arg4[%c0_97, %c0_98] : memref<8x128xf32, #tpu.memory_space<vmem>>, vector<8x128xf32>
      tpu.vector_store %arg4[%c0_97, %c0_98], %139 {strides = array<i32>} : memref<8x128xf32, #tpu.memory_space<vmem>>, vector<8x128xf32>,
    } else {
    }
    %c0 = arith.constant 0 : index
    %c0_1 = arith.constant 0 : index
    %3 = vector.load %arg4[%c0, %c0_1] : memref<8x128xf32, #tpu.memory_space<vmem>>, vector<8x128xf32>
    %cst = arith.constant 5.000000e-01 : f32
    %4 = vector.broadcast %cst : f32 to vector<8x128xf32>
    %5 = arith.mulf %4, %3 : vector<8x128xf32>
    %c0_2 = arith.constant 0 : index
    %c0_3 = arith.constant 0 : index
    %c0_4 = arith.constant 0 : index
    %6 = vector.load %arg2[%c0_2, %c0_3, %c0_4] : memref<8x8x128xf32, #tpu.memory_space<vmem>>, vector<1x8x128xf32>
    %7 = vector.shape_cast %6 : vector<1x8x128xf32> to vector<8x128xf32>
    %8 = arith.addf %5, %7 : vector<8x128xf32>
    %cst_5 = arith.constant 1.000000e+00 : f32
    %9 = vector.broadcast %cst_5 : f32 to vector<8x128xf32>
    %10 = arith.cmpf ogt, %8, %9 : vector<8x128xf32>
    %cst_6 = arith.constant 1.000000e+00 : f32
    %11 = vector.broadcast %cst_6 : f32 to vector<8x128xf32>
    %12 = arith.subf %8, %11 : vector<8x128xf32>
    %13 = arith.select %10, %12, %8 : vector<8x128xi1>, vector<8x128xf32>
    %c0_7 = arith.constant 0 : index
    %c0_8 = arith.constant 0 : index
    %14 = vector.load %arg4[%c0_7, %c0_8] : memref<8x128xf32, #tpu.memory_space<vmem>>, vector<8x128xf32>
    tpu.vector_store %arg4[%c0_7, %c0_8], %13 {strides = array<i32>} : memref<8x128xf32, #tpu.memory_space<vmem>>, vector<8x128xf32>,
    %15 = arith.extui %10 : vector<8x128xi1> to vector<8x128xi32>
    %16 = arith.sitofp %15 : vector<8x128xi32> to vector<8x128xf32>
    %c0_9 = arith.constant 0 : index
    %c0_10 = arith.constant 0 : index
    %c0_11 = arith.constant 0 : index
    %17 = vector.load %arg3[%c0_9, %c0_10, %c0_11] : memref<8x8x128xf32, #tpu.memory_space<vmem>>, vector<1x8x128xf32>
    %18 = vector.shape_cast %17 : vector<1x8x128xf32> to vector<8x128xf32>
    %19 = vector.shape_cast %16 : vector<8x128xf32> to vector<1x8x128xf32>
    tpu.vector_store %arg3[%c0_9, %c0_10, %c0_11], %19 {strides = array<i32>} : memref<8x8x128xf32, #tpu.memory_space<vmem>>, vector<1x8x128xf32>,
    %c0_12 = arith.constant 0 : index
    %c0_13 = arith.constant 0 : index
    %20 = vector.load %arg4[%c0_12, %c0_13] : memref<8x128xf32, #tpu.memory_space<vmem>>, vector<8x128xf32>
    %cst_14 = arith.constant 5.000000e-01 : f32
    %21 = vector.broadcast %cst_14 : f32 to vector<8x128xf32>
    %22 = arith.mulf %21, %20 : vector<8x128xf32>
    %c1 = arith.constant 1 : index
    %c0_15 = arith.constant 0 : index
    %c0_16 = arith.constant 0 : index
    %23 = vector.load %arg2[%c1, %c0_15, %c0_16] : memref<8x8x128xf32, #tpu.memory_space<vmem>>, vector<1x8x128xf32>
    %24 = vector.shape_cast %23 : vector<1x8x128xf32> to vector<8x128xf32>
    %25 = arith.addf %22, %24 : vector<8x128xf32>
    %cst_17 = arith.constant 1.000000e+00 : f32
    %26 = vector.broadcast %cst_17 : f32 to vector<8x128xf32>
    %27 = arith.cmpf ogt, %25, %26 : vector<8x128xf32>
    %cst_18 = arith.constant 1.000000e+00 : f32
    %28 = vector.broadcast %cst_18 : f32 to vector<8x128xf32>
    %29 = arith.subf %25, %28 : vector<8x128xf32>
    %30 = arith.select %27, %29, %25 : vector<8x128xi1>, vector<8x128xf32>
    %c0_19 = arith.constant 0 : index
    %c0_20 = arith.constant 0 : index
    %31 = vector.load %arg4[%c0_19, %c0_20] : memref<8x128xf32, #tpu.memory_space<vmem>>, vector<8x128xf32>
    tpu.vector_store %arg4[%c0_19, %c0_20], %30 {strides = array<i32>} : memref<8x128xf32, #tpu.memory_space<vmem>>, vector<8x128xf32>,
    %32 = arith.extui %27 : vector<8x128xi1> to vector<8x128xi32>
    %33 = arith.sitofp %32 : vector<8x128xi32> to vector<8x128xf32>
    %c1_21 = arith.constant 1 : index
    %c0_22 = arith.constant 0 : index
    %c0_23 = arith.constant 0 : index
    %34 = vector.load %arg3[%c1_21, %c0_22, %c0_23] : memref<8x8x128xf32, #tpu.memory_space<vmem>>, vector<1x8x128xf32>
    %35 = vector.shape_cast %34 : vector<1x8x128xf32> to vector<8x128xf32>
    %36 = vector.shape_cast %33 : vector<8x128xf32> to vector<1x8x128xf32>
    tpu.vector_store %arg3[%c1_21, %c0_22, %c0_23], %36 {strides = array<i32>} : memref<8x8x128xf32, #tpu.memory_space<vmem>>, vector<1x8x128xf32>,
    %c0_24 = arith.constant 0 : index
    %c0_25 = arith.constant 0 : index
    %37 = vector.load %arg4[%c0_24, %c0_25] : memref<8x128xf32, #tpu.memory_space<vmem>>, vector<8x128xf32>
    %cst_26 = arith.constant 5.000000e-01 : f32
    %38 = vector.broadcast %cst_26 : f32 to vector<8x128xf32>
    %39 = arith.mulf %38, %37 : vector<8x128xf32>
    %c2 = arith.constant 2 : index
    %c0_27 = arith.constant 0 : index
    %c0_28 = arith.constant 0 : index
    %40 = vector.load %arg2[%c2, %c0_27, %c0_28] : memref<8x8x128xf32, #tpu.memory_space<vmem>>, vector<1x8x128xf32>
    %41 = vector.shape_cast %40 : vector<1x8x128xf32> to vector<8x128xf32>
    %42 = arith.addf %39, %41 : vector<8x128xf32>
    %cst_29 = arith.constant 1.000000e+00 : f32
    %43 = vector.broadcast %cst_29 : f32 to vector<8x128xf32>
    %44 = arith.cmpf ogt, %42, %43 : vector<8x128xf32>
    %cst_30 = arith.constant 1.000000e+00 : f32
    %45 = vector.broadcast %cst_30 : f32 to vector<8x128xf32>
    %46 = arith.subf %42, %45 : vector<8x128xf32>
    %47 = arith.select %44, %46, %42 : vector<8x128xi1>, vector<8x128xf32>
    %c0_31 = arith.constant 0 : index
    %c0_32 = arith.constant 0 : index
    %48 = vector.load %arg4[%c0_31, %c0_32] : memref<8x128xf32, #tpu.memory_space<vmem>>, vector<8x128xf32>
    tpu.vector_store %arg4[%c0_31, %c0_32], %47 {strides = array<i32>} : memref<8x128xf32, #tpu.memory_space<vmem>>, vector<8x128xf32>,
    %49 = arith.extui %44 : vector<8x128xi1> to vector<8x128xi32>
    %50 = arith.sitofp %49 : vector<8x128xi32> to vector<8x128xf32>
    %c2_33 = arith.constant 2 : index
    %c0_34 = arith.constant 0 : index
    %c0_35 = arith.constant 0 : index
    %51 = vector.load %arg3[%c2_33, %c0_34, %c0_35] : memref<8x8x128xf32, #tpu.memory_space<vmem>>, vector<1x8x128xf32>
    %52 = vector.shape_cast %51 : vector<1x8x128xf32> to vector<8x128xf32>
    %53 = vector.shape_cast %50 : vector<8x128xf32> to vector<1x8x128xf32>
    tpu.vector_store %arg3[%c2_33, %c0_34, %c0_35], %53 {strides = array<i32>} : memref<8x8x128xf32, #tpu.memory_space<vmem>>, vector<1x8x128xf32>,
    %c0_36 = arith.constant 0 : index
    %c0_37 = arith.constant 0 : index
    %54 = vector.load %arg4[%c0_36, %c0_37] : memref<8x128xf32, #tpu.memory_space<vmem>>, vector<8x128xf32>
    %cst_38 = arith.constant 5.000000e-01 : f32
    %55 = vector.broadcast %cst_38 : f32 to vector<8x128xf32>
    %56 = arith.mulf %55, %54 : vector<8x128xf32>
    %c3 = arith.constant 3 : index
    %c0_39 = arith.constant 0 : index
    %c0_40 = arith.constant 0 : index
    %57 = vector.load %arg2[%c3, %c0_39, %c0_40] : memref<8x8x128xf32, #tpu.memory_space<vmem>>, vector<1x8x128xf32>
    %58 = vector.shape_cast %57 : vector<1x8x128xf32> to vector<8x128xf32>
    %59 = arith.addf %56, %58 : vector<8x128xf32>
    %cst_41 = arith.constant 1.000000e+00 : f32
    %60 = vector.broadcast %cst_41 : f32 to vector<8x128xf32>
    %61 = arith.cmpf ogt, %59, %60 : vector<8x128xf32>
    %cst_42 = arith.constant 1.000000e+00 : f32
    %62 = vector.broadcast %cst_42 : f32 to vector<8x128xf32>
    %63 = arith.subf %59, %62 : vector<8x128xf32>
    %64 = arith.select %61, %63, %59 : vector<8x128xi1>, vector<8x128xf32>
    %c0_43 = arith.constant 0 : index
    %c0_44 = arith.constant 0 : index
    %65 = vector.load %arg4[%c0_43, %c0_44] : memref<8x128xf32, #tpu.memory_space<vmem>>, vector<8x128xf32>
    tpu.vector_store %arg4[%c0_43, %c0_44], %64 {strides = array<i32>} : memref<8x128xf32, #tpu.memory_space<vmem>>, vector<8x128xf32>,
    %66 = arith.extui %61 : vector<8x128xi1> to vector<8x128xi32>
    %67 = arith.sitofp %66 : vector<8x128xi32> to vector<8x128xf32>
    %c3_45 = arith.constant 3 : index
    %c0_46 = arith.constant 0 : index
    %c0_47 = arith.constant 0 : index
    %68 = vector.load %arg3[%c3_45, %c0_46, %c0_47] : memref<8x8x128xf32, #tpu.memory_space<vmem>>, vector<1x8x128xf32>
    %69 = vector.shape_cast %68 : vector<1x8x128xf32> to vector<8x128xf32>
    %70 = vector.shape_cast %67 : vector<8x128xf32> to vector<1x8x128xf32>
    tpu.vector_store %arg3[%c3_45, %c0_46, %c0_47], %70 {strides = array<i32>} : memref<8x8x128xf32, #tpu.memory_space<vmem>>, vector<1x8x128xf32>,
    %c0_48 = arith.constant 0 : index
    %c0_49 = arith.constant 0 : index
    %71 = vector.load %arg4[%c0_48, %c0_49] : memref<8x128xf32, #tpu.memory_space<vmem>>, vector<8x128xf32>
    %cst_50 = arith.constant 5.000000e-01 : f32
    %72 = vector.broadcast %cst_50 : f32 to vector<8x128xf32>
    %73 = arith.mulf %72, %71 : vector<8x128xf32>
    %c4 = arith.constant 4 : index
    %c0_51 = arith.constant 0 : index
    %c0_52 = arith.constant 0 : index
    %74 = vector.load %arg2[%c4, %c0_51, %c0_52] : memref<8x8x128xf32, #tpu.memory_space<vmem>>, vector<1x8x128xf32>
    %75 = vector.shape_cast %74 : vector<1x8x128xf32> to vector<8x128xf32>
    %76 = arith.addf %73, %75 : vector<8x128xf32>
    %cst_53 = arith.constant 1.000000e+00 : f32
    %77 = vector.broadcast %cst_53 : f32 to vector<8x128xf32>
    %78 = arith.cmpf ogt, %76, %77 : vector<8x128xf32>
    %cst_54 = arith.constant 1.000000e+00 : f32
    %79 = vector.broadcast %cst_54 : f32 to vector<8x128xf32>
    %80 = arith.subf %76, %79 : vector<8x128xf32>
    %81 = arith.select %78, %80, %76 : vector<8x128xi1>, vector<8x128xf32>
    %c0_55 = arith.constant 0 : index
    %c0_56 = arith.constant 0 : index
    %82 = vector.load %arg4[%c0_55, %c0_56] : memref<8x128xf32, #tpu.memory_space<vmem>>, vector<8x128xf32>
    tpu.vector_store %arg4[%c0_55, %c0_56], %81 {strides = array<i32>} : memref<8x128xf32, #tpu.memory_space<vmem>>, vector<8x128xf32>,
    %83 = arith.extui %78 : vector<8x128xi1> to vector<8x128xi32>
    %84 = arith.sitofp %83 : vector<8x128xi32> to vector<8x128xf32>
    %c4_57 = arith.constant 4 : index
    %c0_58 = arith.constant 0 : index
    %c0_59 = arith.constant 0 : index
    %85 = vector.load %arg3[%c4_57, %c0_58, %c0_59] : memref<8x8x128xf32, #tpu.memory_space<vmem>>, vector<1x8x128xf32>
    %86 = vector.shape_cast %85 : vector<1x8x128xf32> to vector<8x128xf32>
    %87 = vector.shape_cast %84 : vector<8x128xf32> to vector<1x8x128xf32>
    tpu.vector_store %arg3[%c4_57, %c0_58, %c0_59], %87 {strides = array<i32>} : memref<8x8x128xf32, #tpu.memory_space<vmem>>, vector<1x8x128xf32>,
    %c0_60 = arith.constant 0 : index
    %c0_61 = arith.constant 0 : index
    %88 = vector.load %arg4[%c0_60, %c0_61] : memref<8x128xf32, #tpu.memory_space<vmem>>, vector<8x128xf32>
    %cst_62 = arith.constant 5.000000e-01 : f32
    %89 = vector.broadcast %cst_62 : f32 to vector<8x128xf32>
    %90 = arith.mulf %89, %88 : vector<8x128xf32>
    %c5 = arith.constant 5 : index
    %c0_63 = arith.constant 0 : index
    %c0_64 = arith.constant 0 : index
    %91 = vector.load %arg2[%c5, %c0_63, %c0_64] : memref<8x8x128xf32, #tpu.memory_space<vmem>>, vector<1x8x128xf32>
    %92 = vector.shape_cast %91 : vector<1x8x128xf32> to vector<8x128xf32>
    %93 = arith.addf %90, %92 : vector<8x128xf32>
    %cst_65 = arith.constant 1.000000e+00 : f32
    %94 = vector.broadcast %cst_65 : f32 to vector<8x128xf32>
    %95 = arith.cmpf ogt, %93, %94 : vector<8x128xf32>
    %cst_66 = arith.constant 1.000000e+00 : f32
    %96 = vector.broadcast %cst_66 : f32 to vector<8x128xf32>
    %97 = arith.subf %93, %96 : vector<8x128xf32>
    %98 = arith.select %95, %97, %93 : vector<8x128xi1>, vector<8x128xf32>
    %c0_67 = arith.constant 0 : index
    %c0_68 = arith.constant 0 : index
    %99 = vector.load %arg4[%c0_67, %c0_68] : memref<8x128xf32, #tpu.memory_space<vmem>>, vector<8x128xf32>
    tpu.vector_store %arg4[%c0_67, %c0_68], %98 {strides = array<i32>} : memref<8x128xf32, #tpu.memory_space<vmem>>, vector<8x128xf32>,
    %100 = arith.extui %95 : vector<8x128xi1> to vector<8x128xi32>
    %101 = arith.sitofp %100 : vector<8x128xi32> to vector<8x128xf32>
    %c5_69 = arith.constant 5 : index
    %c0_70 = arith.constant 0 : index
    %c0_71 = arith.constant 0 : index
    %102 = vector.load %arg3[%c5_69, %c0_70, %c0_71] : memref<8x8x128xf32, #tpu.memory_space<vmem>>, vector<1x8x128xf32>
    %103 = vector.shape_cast %102 : vector<1x8x128xf32> to vector<8x128xf32>
    %104 = vector.shape_cast %101 : vector<8x128xf32> to vector<1x8x128xf32>
    tpu.vector_store %arg3[%c5_69, %c0_70, %c0_71], %104 {strides = array<i32>} : memref<8x8x128xf32, #tpu.memory_space<vmem>>, vector<1x8x128xf32>,
    %c0_72 = arith.constant 0 : index
    %c0_73 = arith.constant 0 : index
    %105 = vector.load %arg4[%c0_72, %c0_73] : memref<8x128xf32, #tpu.memory_space<vmem>>, vector<8x128xf32>
    %cst_74 = arith.constant 5.000000e-01 : f32
    %106 = vector.broadcast %cst_74 : f32 to vector<8x128xf32>
    %107 = arith.mulf %106, %105 : vector<8x128xf32>
    %c6 = arith.constant 6 : index
    %c0_75 = arith.constant 0 : index
    %c0_76 = arith.constant 0 : index
    %108 = vector.load %arg2[%c6, %c0_75, %c0_76] : memref<8x8x128xf32, #tpu.memory_space<vmem>>, vector<1x8x128xf32>
    %109 = vector.shape_cast %108 : vector<1x8x128xf32> to vector<8x128xf32>
    %110 = arith.addf %107, %109 : vector<8x128xf32>
    %cst_77 = arith.constant 1.000000e+00 : f32
    %111 = vector.broadcast %cst_77 : f32 to vector<8x128xf32>
    %112 = arith.cmpf ogt, %110, %111 : vector<8x128xf32>
    %cst_78 = arith.constant 1.000000e+00 : f32
    %113 = vector.broadcast %cst_78 : f32 to vector<8x128xf32>
    %114 = arith.subf %110, %113 : vector<8x128xf32>
    %115 = arith.select %112, %114, %110 : vector<8x128xi1>, vector<8x128xf32>
    %c0_79 = arith.constant 0 : index
    %c0_80 = arith.constant 0 : index
    %116 = vector.load %arg4[%c0_79, %c0_80] : memref<8x128xf32, #tpu.memory_space<vmem>>, vector<8x128xf32>
    tpu.vector_store %arg4[%c0_79, %c0_80], %115 {strides = array<i32>} : memref<8x128xf32, #tpu.memory_space<vmem>>, vector<8x128xf32>,
    %117 = arith.extui %112 : vector<8x128xi1> to vector<8x128xi32>
    %118 = arith.sitofp %117 : vector<8x128xi32> to vector<8x128xf32>
    %c6_81 = arith.constant 6 : index
    %c0_82 = arith.constant 0 : index
    %c0_83 = arith.constant 0 : index
    %119 = vector.load %arg3[%c6_81, %c0_82, %c0_83] : memref<8x8x128xf32, #tpu.memory_space<vmem>>, vector<1x8x128xf32>
    %120 = vector.shape_cast %119 : vector<1x8x128xf32> to vector<8x128xf32>
    %121 = vector.shape_cast %118 : vector<8x128xf32> to vector<1x8x128xf32>
    tpu.vector_store %arg3[%c6_81, %c0_82, %c0_83], %121 {strides = array<i32>} : memref<8x8x128xf32, #tpu.memory_space<vmem>>, vector<1x8x128xf32>,
    %c0_84 = arith.constant 0 : index
    %c0_85 = arith.constant 0 : index
    %122 = vector.load %arg4[%c0_84, %c0_85] : memref<8x128xf32, #tpu.memory_space<vmem>>, vector<8x128xf32>
    %cst_86 = arith.constant 5.000000e-01 : f32
    %123 = vector.broadcast %cst_86 : f32 to vector<8x128xf32>
    %124 = arith.mulf %123, %122 : vector<8x128xf32>
    %c7 = arith.constant 7 : index
    %c0_87 = arith.constant 0 : index
    %c0_88 = arith.constant 0 : index
    %125 = vector.load %arg2[%c7, %c0_87, %c0_88] : memref<8x8x128xf32, #tpu.memory_space<vmem>>, vector<1x8x128xf32>
    %126 = vector.shape_cast %125 : vector<1x8x128xf32> to vector<8x128xf32>
    %127 = arith.addf %124, %126 : vector<8x128xf32>
    %cst_89 = arith.constant 1.000000e+00 : f32
    %128 = vector.broadcast %cst_89 : f32 to vector<8x128xf32>
    %129 = arith.cmpf ogt, %127, %128 : vector<8x128xf32>
    %cst_90 = arith.constant 1.000000e+00 : f32
    %130 = vector.broadcast %cst_90 : f32 to vector<8x128xf32>
    %131 = arith.subf %127, %130 : vector<8x128xf32>
    %132 = arith.select %129, %131, %127 : vector<8x128xi1>, vector<8x128xf32>
    %c0_91 = arith.constant 0 : index
    %c0_92 = arith.constant 0 : index
    %133 = vector.load %arg4[%c0_91, %c0_92] : memref<8x128xf32, #tpu.memory_space<vmem>>, vector<8x128xf32>
    tpu.vector_store %arg4[%c0_91, %c0_92], %132 {strides = array<i32>} : memref<8x128xf32, #tpu.memory_space<vmem>>, vector<8x128xf32>,
    %134 = arith.extui %129 : vector<8x128xi1> to vector<8x128xi32>
    %135 = arith.sitofp %134 : vector<8x128xi32> to vector<8x128xf32>
    %c7_93 = arith.constant 7 : index
    %c0_94 = arith.constant 0 : index
    %c0_95 = arith.constant 0 : index
    %136 = vector.load %arg3[%c7_93, %c0_94, %c0_95] : memref<8x8x128xf32, #tpu.memory_space<vmem>>, vector<1x8x128xf32>
    %137 = vector.shape_cast %136 : vector<1x8x128xf32> to vector<8x128xf32>
    %138 = vector.shape_cast %135 : vector<8x128xf32> to vector<1x8x128xf32>
    tpu.vector_store %arg3[%c7_93, %c0_94, %c0_95], %138 {strides = array<i32>} : memref<8x8x128xf32, #tpu.memory_space<vmem>>, vector<1x8x128xf32>,
    return
  }
  func.func @transform_0(%arg0: i32, %arg1: i32) -> (i32, i32, i32) {
    %c0_i32 = arith.constant 0 : i32
    %c0_i32_0 = arith.constant 0 : i32
    return %arg1, %arg0, %c0_i32 : i32, i32, i32
  }
  func.func @transform_1(%arg0: i32, %arg1: i32) -> (i32, i32, i32) {
    %c0_i32 = arith.constant 0 : i32
    %c0_i32_0 = arith.constant 0 : i32
    return %arg1, %arg0, %c0_i32 : i32, i32, i32
  }
}

</mosaic_0001>

<bundles_post_ra>
// kernel: tpu_custom_call.1
= control target key start
LH: loop header
LB: loop body
LE: loop exit
PB: predicated region body
PF: predicated region fallthrough
CT: control target
= control target key end

     0   :  { %6 = vsyncpa [#allocation4], 0  ;;  %s759_s0 = inlined_call_operand.hbm [shape: f32[8,16,128], index: 0, kind: input, shape index: {}]   ;;  %s760_s1 = inlined_call_operand.hbm [shape: f32[8,16,128], index: 1, kind: output, shape index: {}]  }
   0x1   :  { %8 = vsyncpa [#allocation4 + $0x1], 0 }
   0x2   :  { %9 = vsyncpa [#allocation5], 0 }
   0x3   :  { %11 = vsyncpa [#allocation5 + $0x1], 0  ;;  %s610_s6 = smov 0   ;;  %s612_s7 = smov 0  }
   0x4   :  { %s614_s8 = smov 0   ;;  %s616_s9 = smov 0  }
   0x5   :  { %s618_s10 = smov 0   ;;  %s620_s11 = smov 0  }
   0x6 LB: > { %s367_s12 = sadd.s32 4294967295, %s591_s11   ;;  %s368_s13 = sadd.s32 4294967294, %s591_s11   ;;  %s591_s11 = sphi %s620_s11, %s17_s11   ;;  %s587_s10 = sphi %s618_s10, %s769_s10   ;;  %s583_s9 = sphi %s616_s9, %s768_s9   ;;  %s579_s8 = sphi %s614_s8, %s767_s8   ;;  %s575_s7 = sphi %s612_s7, %s766_s7   ;;  %s571_s6 = sphi %s610_s6, %s765_s6  }
   0x7   : > { %s29_s14 = sadd.s32 1, %s587_s10  ;;  %s38_s15 = sadd.s32 1, %s579_s8 }
   0x8   : > { %p31_p0 = scmp.ge.s32.totalorder %s29_s14, 2  ;;  %p45_p1 = scmp.ne.s32.totalorder %s579_s8, %s575_s7 }
   0x9   : > { %p46_p2 = scmp.eq.s32.totalorder %s591_s11, 0  ;;  %p51_p3 = scmp.ne.s32.totalorder %s575_s7, %s571_s6 }
   0xa   : > { %s771_s14 = smov (%p31_p0, %s29_s14), 0  ;;  %p52_p5 = scmp.eq.s32.totalorder %s367_s12, 0 }
   0xb   : > { %p651_p4 = por %p46_p2, %p45_p1  ;;  %s34_s17 = ssub.s32 %s587_s10, %s771_s14 }
   0xc   : > { %p77_p6 = scmp.eq.s32.totalorder %s367_s12, 1  ;;  %p36_p7 = scmp.eq.s32.totalorder %s34_s17, 0 }
   0xd   : > { %p657_p8 = por %p52_p5, %p51_p3  ;;  %p83_p10 = scmp.eq.s32.totalorder %s368_s13, 1 }
   0xe   : > { %p661_p9 = por %p77_p6, %p45_p1  ;;  %p370_p12 = scmp.ge.s32.totalorder %s591_s11, 2 }
   0xf   : > { %s666_s20 = scalar_select %p36_p7, %s579_s8, %s38_s15  }
  0x10   : > { %p668_p11 = por %p83_p10, %p51_p3  ;;  %p422_p13 = scmp.lt.s32.totalorder %s591_s11, 2 }
  0x11   : > { %s103_s22 = sand.u32 1, %s579_s8   ;;  %s372_s24 = sshll.u32 %s587_s10, 3 }
  0x12   : > { %s371_s23 = sshll.u32 %s103_s22, 6  ;;  %s114_s27 = scalar_lea.hbm %s759_s0, %s372_s24 }
  0x13   : > { %s107_s28 = scalar_lea.vmem [#allocation3], %s371_s23  ;;  %s115_s30 = sshll.u32 %s114_s27, 4  ;;  %s116_s30 = int_to_ptr.hbm [resolvable:$true] %s115_s30 }
  0x14   : > { %s117_s29 = sshll.u32 %s107_s28, 4  ;;  %p415_p0 = pnand %p422_p13, %p651_p4  ;;  %s118_s29 = int_to_ptr.vmem [resolvable:$true] %s117_s29 }
  0x15   : > { %s104_s2 = scalar_lea.sflag [#allocation4], %s103_s22  ;;  %s593_s3 = smov 256  }
  0x16   : > { %s594_s4 = smov 128   ;;  %s595_s5 = smov 8  }
  0x17   : > { %417 = dma.hbm_to_vmem [thread:$0]  (!%p415_p0), %s116_s30, 1024, %s118_s29, %s104_s2, %s593_s3, %s594_s4, %s595_s5  }
  0x18   : > { %p373_p1 = scmp.ge.s32.totalorder %s591_s11, 1  ;;  %p125_p2 = scmp.lt.s32.totalorder %s591_s11, 3 }
  0x1a   : > { %p126_p3 = pnand %p373_p1, %p125_p2 }
  0x1b   : > { %s684_s12 = sand.u32 (!%p126_p3), 1, %s575_s7  }
  0x1c   : > { %129 = sbr.rel (%p126_p3) target bundleno = 91 (0x5b), region = 24  ;;  %s374_s13 = sshll.u32 (!%p126_p3), %s684_s12, 6 }
  0x1d   : > { %s132_s15 = scalar_lea.sflag (!%p126_p3), [#allocation4], %s684_s12  ;;  %s688_s17 = scalar_lea.vmem (!%p126_p3), [#allocation3], %s374_s13 }
  0x21   : > { %562 = dma.done.wait (%p657_p8), %s132_s15, 1024  }
  0x22   : > { %564 = vsyncadd (%p657_p8), %s132_s15, 4294966272  ;;  %v164_v0 = vld [vmem:[%s688_s17] sm:$0xff]  ;;  %v596_v2 = vmov 0.0   ;;  %s696_s16 = scalar_lea.vmem [#allocation6], %s374_s13  ;;  %v378_v5 = vld [vmem:[%s688_s17 + $0x8] sm:$0xff]  ;;  %s407_s18 = sshll.u32 %s583_s9, 3 }
  0x23   : > { %vm166_vm0 = vcmp.gt.f32.partialorder %v164_v0, 1.0  ;;  %v376_v1 = vadd.f32 -1.0, %v164_v0  ;;  %v382_v11 = vld [vmem:[%s688_s17 + $0x10] sm:$0xff]  ;;  %v386_v17 = vld [vmem:[%s688_s17 + $0x18] sm:$0xff]  ;;  %v390_v23 = vld [vmem:[%s688_s17 + $0x20] sm:$0xff]  ;;  %s278_s24 = scalar_lea.hbm %s760_s1, %s407_s18  ;;  %s279_s25 = sshll.u32 %s696_s16, 4  ;;  %s280_s25 = int_to_ptr.vmem [resolvable:$true] %s279_s25 }
  0x24   : > { %v377_v3 = vsel %vm166_vm0, 1.0, %v596_v2  ;;  %v394_v29 = vld [vmem:[%s688_s17 + $0x28] sm:$0xff]  ;;  %v398_v35 = vld [vmem:[%s688_s17 + $0x30] sm:$0xff]  ;;  %v402_v41 = vld [vmem:[%s688_s17 + $0x38] sm:$0xff]  ;;  %s281_s26 = sshll.u32 %s278_s24, 4  ;;  %s265_s9 = scalar_lea.sflag [#allocation5], %s684_s12  ;;  %s282_s26 = int_to_ptr.hbm [resolvable:$true] %s281_s26 }
  0x25   : > { %v168_v4 = vsel %vm166_vm0, %v376_v1, %v164_v0  ;;  %172 = vst [vmem:[%s696_s16] sm:$0xff] %v377_v3  ;;  %s523_s27 = sshra.s32 %s282_s26, 4  ;;  %s529_s2 = scalar_lea.hbm %s760_s1, 128  ;;  %s524_s27 = int_to_ptr.hbm [resolvable:$true] %s523_s27 }
  0x26   : > { %v174_v6 = vmul.f32 0.5, %v168_v4  ;;  %s525_s28 = scalar_lea.hbm %s524_s27, 64  ;;  %p530_p7 = scmp.lt.s32.totalorder %s524_s27, %s760_s1 }
  0x27   : > { %p526_p4 = scmp.ne.s32.totalorder %s524_s27, %s525_s28  ;;  %p531_p8 = scmp.lt.s32.totalorder %s529_s2, %s525_s28 }
  0x28   : > { %v177_v7 = vadd.f32 %v378_v5, %v174_v6 }
  0x29   : > { %p527_p5 = pnand %p526_p4, %p661_p9  ;;  %p532_p10 = por %p531_p8, %p530_p7 }
  0x2a   : > { %vm178_vm1 = vcmp.gt.f32.partialorder %v177_v7, 1.0  ;;  %v379_v8 = vadd.f32 -1.0, %v177_v7 }
  0x2b   : > { %v380_v9 = vsel %vm178_vm1, 1.0, %v596_v2  ;;  %p528_p6 = pneg %p527_p5 }
  0x2c   : > { %v180_v10 = vsel %vm178_vm1, %v379_v8, %v177_v7  ;;  %381 = vst [vmem:[%s696_s16 + $0x8] sm:$0xff] %v380_v9 }
  0x2d   : > { %v187_v12 = vmul.f32 0.5, %v180_v10  ;;  %p533_p13 = pnand %p532_p10, %p528_p6 }
  0x2f   : > { %v190_v13 = vadd.f32 %v382_v11, %v187_v12 }
  0x31   : > { %vm191_vm2 = vcmp.gt.f32.partialorder %v190_v13, 1.0  ;;  %v383_v14 = vadd.f32 -1.0, %v190_v13 }
  0x32   : > { %v384_v15 = vsel %vm191_vm2, 1.0, %v596_v2 }
  0x33   : > { %v193_v16 = vsel %vm191_vm2, %v383_v14, %v190_v13  ;;  %385 = vst [vmem:[%s696_s16 + $0x10] sm:$0xff] %v384_v15 }
  0x34   : > { %v200_v18 = vmul.f32 0.5, %v193_v16 }
  0x36   : > { %v203_v19 = vadd.f32 %v386_v17, %v200_v18 }
  0x38   : > { %vm204_vm3 = vcmp.gt.f32.partialorder %v203_v19, 1.0  ;;  %v387_v20 = vadd.f32 -1.0, %v203_v19 }
  0x39   : > { %v388_v21 = vsel %vm204_vm3, 1.0, %v596_v2 }
  0x3a   : > { %v206_v22 = vsel %vm204_vm3, %v387_v20, %v203_v19  ;;  %389 = vst [vmem:[%s696_s16 + $0x18] sm:$0xff] %v388_v21 }
  0x3b   : > { %v213_v24 = vmul.f32 0.5, %v206_v22 }
  0x3d   : > { %v216_v25 = vadd.f32 %v390_v23, %v213_v24 }
  0x3f   : > { %vm217_vm4 = vcmp.gt.f32.partialorder %v216_v25, 1.0  ;;  %v391_v26 = vadd.f32 -1.0, %v216_v25 }
  0x40   : > { %v392_v27 = vsel %vm217_vm4, 1.0, %v596_v2 }
  0x41   : > { %v219_v28 = vsel %vm217_vm4, %v391_v26, %v216_v25  ;;  %393 = vst [vmem:[%s696_s16 + $0x20] sm:$0xff] %v392_v27 }
  0x42   : > { %v226_v30 = vmul.f32 0.5, %v219_v28 }
  0x44   : > { %v229_v31 = vadd.f32 %v394_v29, %v226_v30 }
  0x46   : > { %vm230_vm5 = vcmp.gt.f32.partialorder %v229_v31, 1.0  ;;  %v395_v32 = vadd.f32 -1.0, %v229_v31 }
  0x47   : > { %v396_v33 = vsel %vm230_vm5, 1.0, %v596_v2 }
  0x48   : > { %v232_v34 = vsel %vm230_vm5, %v395_v32, %v229_v31  ;;  %397 = vst [vmem:[%s696_s16 + $0x28] sm:$0xff] %v396_v33 }
  0x49   : > { %v239_v36 = vmul.f32 0.5, %v232_v34 }
  0x4b   : > { %v242_v37 = vadd.f32 %v398_v35, %v239_v36 }
  0x4d   : > { %vm243_vm6 = vcmp.gt.f32.partialorder %v242_v37, 1.0  ;;  %v399_v38 = vadd.f32 -1.0, %v242_v37 }
  0x4e   : > { %v400_v39 = vsel %vm243_vm6, 1.0, %v596_v2 }
  0x4f   : > { %v245_v40 = vsel %vm243_vm6, %v399_v38, %v242_v37  ;;  %401 = vst [vmem:[%s696_s16 + $0x30] sm:$0xff] %v400_v39 }
  0x50   : > { %v252_v42 = vmul.f32 0.5, %v245_v40 }
  0x52   : > { %v255_v43 = vadd.f32 %v402_v41, %v252_v42 }
  0x54   : > { %vm256_vm7 = vcmp.gt.f32.partialorder %v255_v43, 1.0 }
  0x55   : > { %v404_v44 = vsel %vm256_vm7, 1.0, %v596_v2 }
  0x56   : > { %405 = vst [vmem:[%s696_s16 + $0x38] sm:$0xff] %v404_v44 }
  0x57   : > { %536 = shalt.err (!%p533_p13)
}
  0x58   : > { %s597_s5 = smov 128   ;;  %s598_s12 = smov 256  }
  0x59   : > { %s599_s13 = smov 8  }
  0x5a   : > { %412 = dma.vmem_to_hbm [thread:$0]  (%p661_p9), %s280_s25, 1024, %s282_s26, %s265_s9, %s597_s5, %s598_s12, %s599_s13  }
  0x5b PF: > { %s296_s15 = sand.u32 1, %s571_s6   ;;  %p419_p0 = pnand %p370_p12, %p668_p11 }
  0x5c   : > { %s297_s17 = scalar_lea.sflag [#allocation5], %s296_s15 }
  0x5d   : > { %p420_p1 = pneg %p419_p0 }
  0x5f   : > { %566 = dma.done.wait (%p420_p1), %s297_s17, 1024  }
  0x60   : > { %568 = vsyncadd (%p420_p1), %s297_s17, 4294966272  ;;  %s17_s11 = sadd.s32 1, %s591_s11   ;;  %s765_s6 = smov %s575_s7 }
  0x61   : > { %p14_p2 = scmp.ge.s32.totalorder %s17_s11, 4   ;;  %s766_s7 = smov %s579_s8 }
  0x62   : > { %s767_s8 = smov %s666_s20  ;;  %s768_s9 = smov %s587_s10 }
  0x63   : > { %s769_s10 = smov %s771_s14  ;;  %16 = sbr.rel (!%p14_p2) target bundleno = 6 (0x6), region = 87 }
  0x68   :  { %303 = vsyncpa [#allocation4], 1 }
  0x69   :  { %305 = vsyncpa [#allocation4 + $0x1], 1 }
  0x6a   :  { %306 = vsyncpa [#allocation5], 1 }
  0x6b   :  { %308 = vsyncpa [#allocation5 + $0x1], 1 }

</bundles_post_ra>
